<compile_context>
chip_gen: v6e
topology: v6e:2x2x1
jax: 0.10.0
libtpu: 0.0.40
codegen_flags: <defaults>
</compile_context>

<pallas_src>
import functools

import jax
import jax.numpy as jnp
from jax.experimental import pallas as pl
from jax.experimental.pallas import tpu as pltpu

_LANE = 128


def _round_up(x, m):
    return ((x + m - 1) // m) * m


def _iou_loss_kernel(p_ref, t_ref, o_ref, *, loss_type: str):
    # p_ref / t_ref: (4, tile_r, 128) f32, component-major.
    # o_ref: (tile_r, 128) f32 lane-dense loss slab.
    px, py, pw, ph = p_ref[0], p_ref[1], p_ref[2], p_ref[3]
    gx, gy, gw, gh = t_ref[0], t_ref[1], t_ref[2], t_ref[3]

    pw_h = pw * 0.5
    ph_h = ph * 0.5
    gw_h = gw * 0.5
    gh_h = gh * 0.5

    # Corner candidates, hoisted once and reused for both the intersection
    # and (giou/diou) the enclosing box.
    p_l = px - pw_h
    p_r = px + pw_h
    p_t = py - ph_h
    p_b = py + ph_h
    g_l = gx - gw_h
    g_r = gx + gw_h
    g_t = gy - gh_h
    g_b = gy + gh_h

    tl_x = jnp.maximum(p_l, g_l)
    tl_y = jnp.maximum(p_t, g_t)
    br_x = jnp.minimum(p_r, g_r)
    br_y = jnp.minimum(p_b, g_b)

    area_p = pw * ph
    area_g = gw * gh

    inter = (br_x - tl_x) * (br_y - tl_y)
    valid = (tl_x < br_x) & (tl_y < br_y)        # strict '<' like the module
    area_i = jnp.where(valid, inter, 0.0)         # single select, no cast-mul
    area_u = area_p + area_g - area_i
    # EUP approx reciprocal instead of a VALU divide sequence.
    iou = area_i * pl.reciprocal(area_u + 1e-16, approx=True)

    if loss_type == "iou":
        # alpha = 5
        iou2 = iou * iou
        loss = 1.0 - iou2 * iou2 * iou
    elif loss_type == "giou":
        c_w = jnp.maximum(p_r, g_r) - jnp.minimum(p_l, g_l)
        c_h = jnp.maximum(p_b, g_b) - jnp.minimum(p_t, g_t)
        area_c = c_w * c_h
        giou = iou - (area_c - area_u) * pl.reciprocal(
            jnp.maximum(area_c, 1e-16), approx=True)
        loss = 1.0 - jnp.clip(giou, -1.0, 1.0)
    elif loss_type == "diou":
        # alpha = 2
        c_w = jnp.maximum(p_r, g_r) - jnp.minimum(p_l, g_l)
        c_h = jnp.maximum(p_b, g_b) - jnp.minimum(p_t, g_t)
        c = c_w * c_w + c_h * c_h
        w_d = px - gx
        h_d = py - gy
        d = w_d * w_d + h_d * h_d
        c4 = jnp.maximum((c * c) * (c * c), 1e-16)
        d4 = (d * d) * (d * d)
        diou = iou * iou - d4 * pl.reciprocal(c4, approx=True)
        loss = 1.0 - jnp.clip(diou, -1.0, 1.0)
    else:
        raise ValueError(f"unknown loss_type {loss_type}")

    o_ref[...] = loss


def iou_loss(pred, target, *, reduction="none", loss_type="iou", tile_rows=512):
    """Pallas implementation of YOLOX IOUloss.forward.

    pred / target: any shape that reshapes to (-1, 4), float32.
    """
    assert pred.shape[0] == target.shape[0]
    pred = pred.reshape(-1, 4).astype(jnp.float32)
    target = target.reshape(-1, 4).astype(jnp.float32)
    n = pred.shape[0]

    rows = pl.cdiv(n, _LANE)                       # 128 boxes per row
    tile_r = min(tile_rows, _round_up(rows, 8))    # sublane-aligned tile
    r_pad = _round_up(rows, tile_r)
    n_pad = r_pad * _LANE

    def pack(x):
        # (N, 4) -> component-major (4, r_pad, 128); XLA may fuse this
        # transpose/pad into the pallas_call (allow_input_fusion below).
        xt = jnp.transpose(x)
        xt = jnp.pad(xt, ((0, 0), (0, n_pad - n)))
        return xt.reshape(4, r_pad, _LANE)

    kernel = functools.partial(_iou_loss_kernel, loss_type=loss_type)

    out = pl.pallas_call(
        kernel,
        out_shape=jax.ShapeDtypeStruct((r_pad, _LANE), jnp.float32),
        grid_spec=pltpu.PrefetchScalarGridSpec(
            num_scalar_prefetch=0,
            grid=(r_pad // tile_r,),
            in_specs=[
                pl.BlockSpec((4, tile_r, _LANE), lambda i: (0, i, 0)),
                pl.BlockSpec((4, tile_r, _LANE), lambda i: (0, i, 0)),
            ],
            out_specs=pl.BlockSpec((tile_r, _LANE), lambda i: (i, 0)),
        ),
        compiler_params=pltpu.CompilerParams(
            dimension_semantics=("parallel",),
            allow_input_fusion=[True, True],
        ),
    )(pack(pred), pack(target))

    # Padded lanes produce loss=1 but are sliced off before any reduction.
    loss = out.reshape(n_pad)[:n]

    if reduction == "mean":
        loss = loss.mean()
    elif reduction == "sum":
        loss = loss.sum()
    return loss


def _iou_loss_ref(pred, target, *, loss_type="iou"):
    """Pure-JAX reference mirroring the PyTorch module (reduction='none')."""
    pred = pred.reshape(-1, 4).astype(jnp.float32)
    target = target.reshape(-1, 4).astype(jnp.float32)
    tl = jnp.maximum(pred[:, :2] - pred[:, 2:] / 2, target[:, :2] - target[:, 2:] / 2)
    br = jnp.minimum(pred[:, :2] + pred[:, 2:] / 2, target[:, :2] + target[:, 2:] / 2)
    area_p = jnp.prod(pred[:, 2:], axis=1)
    area_g = jnp.prod(target[:, 2:], axis=1)
    en = jnp.prod((tl < br).astype(jnp.float32), axis=1)
    area_i = jnp.prod(br - tl, axis=1) * en
    area_u = area_p + area_g - area_i
    iou = area_i / (area_u + 1e-16)
    if loss_type == "iou":
        return 1.0 - iou ** 5
    elif loss_type == "giou":
        c_tl = jnp.minimum(pred[:, :2] - pred[:, 2:] / 2, target[:, :2] - target[:, 2:] / 2)
        c_br = jnp.maximum(pred[:, :2] + pred[:, 2:] / 2, target[:, :2] + target[:, 2:] / 2)
        area_c = jnp.prod(c_br - c_tl, axis=1)
        giou = iou - (area_c - area_u) / jnp.maximum(area_c, 1e-16)
        return 1.0 - jnp.clip(giou, -1.0, 1.0)
    elif loss_type == "diou":
        c_tl = jnp.minimum(pred[:, :2] - pred[:, 2:] / 2, target[:, :2] - target[:, 2:] / 2)
        c_br = jnp.maximum(pred[:, :2] + pred[:, 2:] / 2, target[:, :2] + target[:, 2:] / 2)
        wh_c = c_br - c_tl
        c = wh_c[:, 0] ** 2 + wh_c[:, 1] ** 2
        wh_d = pred[:, :2] - target[:, :2]
        d = wh_d[:, 0] ** 2 + wh_d[:, 1] ** 2
        diou = iou ** 2 - d ** 4 / jnp.maximum(c ** 4, 1e-16)
        return 1.0 - jnp.clip(diou, -1.0, 1.0)


if __name__ == "__main__":
    key = jax.random.PRNGKey(0)
    k1, k2, k3, k4 = jax.random.split(key, 4)

    N = 16  # number of boxes (module views inputs as (-1, 4))
    # boxes: centers in [0, 10), sizes in [1, 5) -> realistic positive w/h
    pred = jnp.concatenate(
        [jax.random.uniform(k1, (N, 2), jnp.float32, 0.0, 10.0),
         jax.random.uniform(k2, (N, 2), jnp.float32, 1.0, 5.0)], axis=1)
    target = jnp.concatenate(
        [jax.random.uniform(k3, (N, 2), jnp.float32, 0.0, 10.0),
         jax.random.uniform(k4, (N, 2), jnp.float32, 1.0, 5.0)], axis=1)

    ok = True
    for lt in ("iou", "giou", "diou"):
        out = jax.block_until_ready(iou_loss(pred, target, loss_type=lt))
        ref = _iou_loss_ref(pred, target, loss_type=lt)
        # tolerance accounts for the EUP approx-reciprocal (~1e-3 rel error)
        if not jnp.allclose(out, ref, atol=1e-2, rtol=1e-2):
            ok = False
            print(f"MISMATCH for loss_type={lt}")

    # also exercise reductions (done in glue, like the module's tail)
    _ = jax.block_until_ready(iou_loss(pred, target, reduction="mean"))
    _ = jax.block_until_ready(iou_loss(pred, target, reduction="sum"))

    if ok:
        print("KERNEL_OK")
</pallas_src>

<mosaic_0001>
module attributes {stable_mosaic.version = 11 : i64} {
  func.func @_iou_loss_kernel(%arg0: i32, %arg1: memref<4x8x128xf32, #tpu.memory_space<vmem>>, %arg2: memref<4x8x128xf32, #tpu.memory_space<vmem>>, %arg3: memref<8x128xf32, #tpu.memory_space<vmem>>) attributes {dimension_semantics = [#tpu.dimension_semantics<parallel>], iteration_bounds = array<i64: 1>, scalar_prefetch = 0 : i64, scratch_operands = 0 : i64, tpu.core_type = #tpu.core_type<tc>, window_params = [{transform_indices = @transform_0, window_bounds = array<i64: 4, 8, 128>}, {transform_indices = @transform_1, window_bounds = array<i64: 4, 8, 128>}, {transform_indices = @transform_2, window_bounds = array<i64: 8, 128>}]} {
    %c0 = arith.constant 0 : index
    %c0_0 = arith.constant 0 : index
    %c0_1 = arith.constant 0 : index
    %0 = vector.load %arg1[%c0, %c0_0, %c0_1] : memref<4x8x128xf32, #tpu.memory_space<vmem>>, vector<1x8x128xf32>
    %1 = vector.shape_cast %0 : vector<1x8x128xf32> to vector<8x128xf32>
    %c1 = arith.constant 1 : index
    %c0_2 = arith.constant 0 : index
    %c0_3 = arith.constant 0 : index
    %2 = vector.load %arg1[%c1, %c0_2, %c0_3] : memref<4x8x128xf32, #tpu.memory_space<vmem>>, vector<1x8x128xf32>
    %3 = vector.shape_cast %2 : vector<1x8x128xf32> to vector<8x128xf32>
    %c2 = arith.constant 2 : index
    %c0_4 = arith.constant 0 : index
    %c0_5 = arith.constant 0 : index
    %4 = vector.load %arg1[%c2, %c0_4, %c0_5] : memref<4x8x128xf32, #tpu.memory_space<vmem>>, vector<1x8x128xf32>
    %5 = vector.shape_cast %4 : vector<1x8x128xf32> to vector<8x128xf32>
    %c3 = arith.constant 3 : index
    %c0_6 = arith.constant 0 : index
    %c0_7 = arith.constant 0 : index
    %6 = vector.load %arg1[%c3, %c0_6, %c0_7] : memref<4x8x128xf32, #tpu.memory_space<vmem>>, vector<1x8x128xf32>
    %7 = vector.shape_cast %6 : vector<1x8x128xf32> to vector<8x128xf32>
    %c0_8 = arith.constant 0 : index
    %c0_9 = arith.constant 0 : index
    %c0_10 = arith.constant 0 : index
    %8 = vector.load %arg2[%c0_8, %c0_9, %c0_10] : memref<4x8x128xf32, #tpu.memory_space<vmem>>, vector<1x8x128xf32>
    %9 = vector.shape_cast %8 : vector<1x8x128xf32> to vector<8x128xf32>
    %c1_11 = arith.constant 1 : index
    %c0_12 = arith.constant 0 : index
    %c0_13 = arith.constant 0 : index
    %10 = vector.load %arg2[%c1_11, %c0_12, %c0_13] : memref<4x8x128xf32, #tpu.memory_space<vmem>>, vector<1x8x128xf32>
    %11 = vector.shape_cast %10 : vector<1x8x128xf32> to vector<8x128xf32>
    %c2_14 = arith.constant 2 : index
    %c0_15 = arith.constant 0 : index
    %c0_16 = arith.constant 0 : index
    %12 = vector.load %arg2[%c2_14, %c0_15, %c0_16] : memref<4x8x128xf32, #tpu.memory_space<vmem>>, vector<1x8x128xf32>
    %13 = vector.shape_cast %12 : vector<1x8x128xf32> to vector<8x128xf32>
    %c3_17 = arith.constant 3 : index
    %c0_18 = arith.constant 0 : index
    %c0_19 = arith.constant 0 : index
    %14 = vector.load %arg2[%c3_17, %c0_18, %c0_19] : memref<4x8x128xf32, #tpu.memory_space<vmem>>, vector<1x8x128xf32>
    %15 = vector.shape_cast %14 : vector<1x8x128xf32> to vector<8x128xf32>
    %cst = arith.constant 5.000000e-01 : f32
    %16 = vector.broadcast %cst : f32 to vector<8x128xf32>
    %17 = arith.mulf %5, %16 : vector<8x128xf32>
    %cst_20 = arith.constant 5.000000e-01 : f32
    %18 = vector.broadcast %cst_20 : f32 to vector<8x128xf32>
    %19 = arith.mulf %7, %18 : vector<8x128xf32>
    %cst_21 = arith.constant 5.000000e-01 : f32
    %20 = vector.broadcast %cst_21 : f32 to vector<8x128xf32>
    %21 = arith.mulf %13, %20 : vector<8x128xf32>
    %cst_22 = arith.constant 5.000000e-01 : f32
    %22 = vector.broadcast %cst_22 : f32 to vector<8x128xf32>
    %23 = arith.mulf %15, %22 : vector<8x128xf32>
    %24 = arith.subf %1, %17 : vector<8x128xf32>
    %25 = arith.addf %1, %17 : vector<8x128xf32>
    %26 = arith.subf %3, %19 : vector<8x128xf32>
    %27 = arith.addf %3, %19 : vector<8x128xf32>
    %28 = arith.subf %9, %21 : vector<8x128xf32>
    %29 = arith.addf %9, %21 : vector<8x128xf32>
    %30 = arith.subf %11, %23 : vector<8x128xf32>
    %31 = arith.addf %11, %23 : vector<8x128xf32>
    %32 = arith.maximumf %24, %28 : vector<8x128xf32>
    %33 = arith.maximumf %26, %30 : vector<8x128xf32>
    %34 = arith.minimumf %25, %29 : vector<8x128xf32>
    %35 = arith.minimumf %27, %31 : vector<8x128xf32>
    %36 = arith.mulf %5, %7 : vector<8x128xf32>
    %37 = arith.mulf %13, %15 : vector<8x128xf32>
    %38 = arith.subf %34, %32 : vector<8x128xf32>
    %39 = arith.subf %35, %33 : vector<8x128xf32>
    %40 = arith.mulf %38, %39 : vector<8x128xf32>
    %41 = arith.cmpf olt, %32, %34 : vector<8x128xf32>
    %42 = arith.cmpf olt, %33, %35 : vector<8x128xf32>
    %43 = arith.andi %41, %42 : vector<8x128xi1>
    %cst_23 = arith.constant 0.000000e+00 : f32
    %44 = vector.broadcast %cst_23 : f32 to vector<8x128xf32>
    %45 = arith.select %43, %40, %44 : vector<8x128xi1>, vector<8x128xf32>
    %46 = arith.addf %36, %37 : vector<8x128xf32>
    %47 = arith.subf %46, %45 : vector<8x128xf32>
    %cst_24 = arith.constant 1.000000e-16 : f32
    %48 = vector.broadcast %cst_24 : f32 to vector<8x128xf32>
    %49 = arith.addf %47, %48 : vector<8x128xf32>
    %50 = tpu.reciprocal %49 {approx = true} : vector<8x128xf32> -> vector<8x128xf32>
    %51 = arith.mulf %45, %50 : vector<8x128xf32>
    %52 = arith.mulf %51, %51 : vector<8x128xf32>
    %53 = arith.mulf %52, %52 : vector<8x128xf32>
    %54 = arith.mulf %53, %51 : vector<8x128xf32>
    %cst_25 = arith.constant 1.000000e+00 : f32
    %55 = vector.broadcast %cst_25 : f32 to vector<8x128xf32>
    %56 = arith.subf %55, %54 : vector<8x128xf32>
    %c0_26 = arith.constant 0 : index
    %c0_27 = arith.constant 0 : index
    %57 = vector.load %arg3[%c0_26, %c0_27] : memref<8x128xf32, #tpu.memory_space<vmem>>, vector<8x128xf32>
    tpu.vector_store %arg3[%c0_26, %c0_27], %56 {strides = array<i32>} : memref<8x128xf32, #tpu.memory_space<vmem>>, vector<8x128xf32>,
    return
  }
  func.func @transform_0(%arg0: i32) -> (i32, i32, i32) {
    %c0_i32 = arith.constant 0 : i32
    %c0_i32_0 = arith.constant 0 : i32
    %c0_i32_1 = arith.constant 0 : i32
    return %c0_i32, %arg0, %c0_i32_0 : i32, i32, i32
  }
  func.func @transform_1(%arg0: i32) -> (i32, i32, i32) {
    %c0_i32 = arith.constant 0 : i32
    %c0_i32_0 = arith.constant 0 : i32
    %c0_i32_1 = arith.constant 0 : i32
    return %c0_i32, %arg0, %c0_i32_0 : i32, i32, i32
  }
  func.func @transform_2(%arg0: i32) -> (i32, i32) {
    %c0_i32 = arith.constant 0 : i32
    %c0_i32_0 = arith.constant 0 : i32
    return %arg0, %c0_i32 : i32, i32
  }
}

</mosaic_0001>

<bundles_post_ra>
// kernel: tpu_custom_call.1
= control target key start
LH: loop header
LB: loop body
LE: loop exit
PB: predicated region body
PF: predicated region fallthrough
CT: control target
= control target key end

     0   :  { %7 = vsyncpa [#allocation3], 0  ;;  %s207_s0 = inlined_call_operand.hbm [shape: f32[4,8,128], index: 0, kind: input, shape index: {}]   ;;  %s208_s1 = inlined_call_operand.hbm [shape: f32[4,8,128], index: 1, kind: input, shape index: {}]   ;;  %s209_s2 = inlined_call_operand.hbm [shape: f32[8,128], index: 2, kind: output, shape index: {}]  }
   0x1   :  { %8 = vsyncpa [#allocation6], 0 }
   0x2   :  { %9 = vsyncpa [#allocation4], 0  ;;  %s178_s9 = smov [#allocation2]  }
   0x3   :  { %s15_s10 = sshll.u32 %s178_s9, 4  ;;  %s16_s10 = int_to_ptr.vmem [resolvable:$true] %s15_s10 }
   0x4   :  { %s120_s11 = scalar_lea.vmem %s16_s10, 512  ;;  %p125_p1 = scmp.lt.s32.totalorder %s16_s10, %s16_s10 }
   0x5   :  { %p121_p0 = scmp.ne.s32.totalorder %s16_s10, %s120_s11  ;;  %p126_p2 = scmp.lt.s32.totalorder %s120_s11, %s120_s11 }
   0x7   :  { %p127_p3 = por %p126_p2, %p125_p1 }
   0x9   :  { %p128_p4 = pnand %p127_p3, %p121_p0 }
   0xb   :  { %131 = shalt.err (!%p128_p4)
}
   0xc   :  { %s179_s12 = smov 128   ;;  %s180_s13 = smov 8  }
   0xd   :  { %21 = dma.hbm_to_vmem [thread:$0]  %s207_s0, 512, %s16_s10, [#allocation3], %s179_s12, %s179_s12, %s180_s13  }
   0xe   :  { %s181_s16 = smov [#allocation5]  }
   0xf   :  { %s27_s17 = sshll.u32 %s181_s16, 4  ;;  %s28_s17 = int_to_ptr.vmem [resolvable:$true] %s27_s17 }
  0x10   :  { %s140_s18 = scalar_lea.vmem %s28_s17, 512  ;;  %p145_p6 = scmp.lt.s32.totalorder %s28_s17, %s28_s17 }
  0x11   :  { %p141_p5 = scmp.ne.s32.totalorder %s28_s17, %s140_s18  ;;  %p146_p7 = scmp.lt.s32.totalorder %s140_s18, %s140_s18 }
  0x13   :  { %p147_p8 = por %p146_p7, %p145_p6 }
  0x15   :  { %p148_p9 = pnand %p147_p8, %p141_p5 }
  0x17   :  { %151 = shalt.err (!%p148_p9)
}
  0x18   :  { %33 = dma.hbm_to_vmem [thread:$0]  %s208_s1, 512, %s28_s17, [#allocation6], %s179_s12, %s179_s12, %s180_s13  }
  0x19   :  { %172 = dma.done.wait [#allocation3], 512  }
  0x1a   :  { %173 = vsyncadd [#allocation3], 4294966784 }
  0x1b   :  { %174 = dma.done.wait [#allocation6], 512  }
  0x1c   :  { %175 = vsyncadd [#allocation6], 4294966784  ;;  %v40_v0 = vld [vmem:[#allocation2] sm:$0xff]  ;;  %v44_v1 = vld [vmem:[#allocation2 + $0x10] sm:$0xff]  ;;  %s182_s0 = smov [#allocation7]  }
  0x1d   :  { %v42_v2 = vld [vmem:[#allocation2 + $0x8] sm:$0xff]  ;;  %v46_v3 = vld [vmem:[#allocation2 + $0x18] sm:$0xff]  ;;  %v47_v4 = vld [vmem:[#allocation5] sm:$0xff]  ;;  %v54_v5 = vmul.f32 0.5, %v44_v1  ;;  %s95_s1 = sshll.u32 %s182_s0, 4  ;;  %s96_s1 = int_to_ptr.vmem [resolvable:$true] %s95_s1 }
  0x1e   :  { %v49_v6 = vld [vmem:[#allocation5 + $0x8] sm:$0xff]  ;;  %v51_v7 = vld [vmem:[#allocation5 + $0x10] sm:$0xff]  ;;  %v53_v8 = vld [vmem:[#allocation5 + $0x18] sm:$0xff]  ;;  %v55_v9 = vmul.f32 0.5, %v46_v3  ;;  %v70_v20 = vmul.f32 %v46_v3, %v44_v1  ;;  %s152_s21 = scalar_lea.vmem %s96_s1, 128  ;;  %p157_p11 = scmp.lt.s32.totalorder %s96_s1, %s96_s1 }
  0x1f   :  { %v56_v10 = vmul.f32 0.5, %v51_v7  ;;  %v57_v11 = vmul.f32 0.5, %v53_v8  ;;  %v58_v12 = vsub.f32 %v40_v0, %v54_v5  ;;  %v59_v13 = vadd.f32 %v54_v5, %v40_v0  ;;  %p153_p10 = scmp.ne.s32.totalorder %s96_s1, %s152_s21  ;;  %p158_p12 = scmp.lt.s32.totalorder %s152_s21, %s152_s21 }
  0x20   :  { %v60_v14 = vsub.f32 %v42_v2, %v55_v9  ;;  %v61_v15 = vadd.f32 %v55_v9, %v42_v2  ;;  %v71_v21 = vmul.f32 %v53_v8, %v51_v7 }
  0x21   :  { %v62_v16 = vsub.f32 %v47_v4, %v56_v10  ;;  %v63_v17 = vadd.f32 %v56_v10, %v47_v4  ;;  %v64_v18 = vsub.f32 %v49_v6, %v57_v11  ;;  %v65_v19 = vadd.f32 %v57_v11, %v49_v6  ;;  %p159_p13 = por %p158_p12, %p157_p11 }
  0x22   :  { %v79_v28 = vadd.f32 %v71_v21, %v70_v20 }
  0x23   :  { %v66_v22 = vmax.f32 %v58_v12, %v62_v16  ;;  %v67_v23 = vmax.f32 %v60_v14, %v64_v18  ;;  %v68_v24 = vmin.f32 %v59_v13, %v63_v17  ;;  %v69_v25 = vmin.f32 %v61_v15, %v65_v19  ;;  %p160_p0 = pnand %p159_p13, %p153_p10 }
  0x25   :  { %v72_v26 = vsub.f32 %v68_v24, %v66_v22  ;;  %v73_v27 = vsub.f32 %v69_v25, %v67_v23  ;;  %vm75_vm0 = vcmp.lt.f32.partialorder %v66_v22, %v68_v24  ;;  %vm76_vm1 = vcmp.lt.f32.partialorder %v67_v23, %v69_v25 }
  0x26   :  { %vm77_vm2 = vmand %vm75_vm0, %vm76_vm1 }
  0x27   :  { %v74_v29 = vmul.f32 %v73_v27, %v72_v26 }
  0x29   :  { %v78_v30 = vsel %vm77_vm2, %v74_v29, 0.0 }
  0x2a   :  { %v80_v31 = vsub.f32 %v79_v28, %v78_v30 }
  0x2c   :  { %v81_v32 = vadd.f32 1e-16, %v80_v31 }
  0x2e   :  { %110 = vrcp.f32 %v81_v32 }
  0x3b   :  { %v111_v33 = vpop.eup %110 }
  0x3c   :  { %v83_v34 = vmul.f32 %v111_v33, %v78_v30 }
  0x3e   :  { %v84_v35 = vmul.f32 %v83_v34, %v83_v34 }
  0x40   :  { %v85_v36 = vmul.f32 %v84_v35, %v84_v35 }
  0x42   :  { %v86_v37 = vmul.f32 %v85_v36, %v83_v34 }
  0x44   :  { %v87_v38 = vsub.f32 1.0, %v86_v37 }
  0x46   :  { %88 = vst [vmem:[#allocation7] sm:$0xff] %v87_v38 }
  0x47   :  { %163 = shalt.err (!%p160_p0)
}
  0x48   :  { %98 = dma.vmem_to_hbm [thread:$0]  %s96_s1, 128, %s209_s2, [#allocation4]  }
  0x49   :  { %176 = dma.done.wait [#allocation4], 128  }
  0x4a   :  { %177 = vsyncadd [#allocation4], 4294967168 }
  0x4b   :  { %102 = vsyncpa [#allocation3], 1 }
  0x4c   :  { %103 = vsyncpa [#allocation6], 1 }
  0x4d   :  { %104 = vsyncpa [#allocation4], 1 }

</bundles_post_ra>
